<compile_context>
chip_gen: v7x
topology: tpu7x:2x2x1
jax: 0.10.0
libtpu: 0.0.40
codegen_flags: <defaults>
</compile_context>

<pallas_src>
import functools

import jax
import jax.numpy as jnp
from jax.experimental import pallas as pl
from jax.experimental.pallas import tpu as pltpu


def _round_up(n, m):
    return ((n + m - 1) // m) * m


def _policy_kernel(x_ref, w1_ref, b1_ref, w2_ref, b2_ref, w3_ref, b3_ref, out_ref):
    """Transposed MLP: activations are (features, TILE_B), batch along lanes."""
    w_dtype = w1_ref.dtype
    x = x_ref[...]                                                   # (in_dim, tb)

    # Layer 0: Linear + ReLU  (f32 accumulation on the MXU, f32 elementwise)
    h1 = jnp.dot(w1_ref[...], x, preferred_element_type=jnp.float32) + b1_ref[...]
    h1 = jnp.maximum(h1, 0.0).astype(w_dtype)                        # (hidden, tb)

    # Layer 1: Linear + ReLU
    h2 = jnp.dot(w2_ref[...], h1, preferred_element_type=jnp.float32) + b2_ref[...]
    h2 = jnp.maximum(h2, 0.0).astype(w_dtype)                        # (hidden, tb)

    # Layer 2: Linear + Tanh (EUP)
    out = jnp.dot(w3_ref[...], h2, preferred_element_type=jnp.float32) + b3_ref[...]
    out_ref[...] = jnp.tanh(out).astype(out_ref.dtype)               # (act_dim, tb)


def policy_forward(x, params, *, tile_b=512, compute_dtype=None):
    """Runs tanh(fc2(relu(fc1(relu(fc0(x)))))) in a single Pallas kernel.

    x:      (batch, obs_dim) float32
    params: (w1, b1, w2, b2, w3, b3) with weights in PyTorch (out, in) layout.
    compute_dtype: optional dtype (e.g. jnp.bfloat16) for the streamed input
                   and weights; accumulation / activations stay f32.
    Returns (batch, action_dim) float32.
    """
    w1, b1, w2, b2, w3, b3 = params
    batch, in_dim = x.shape
    hidden = w1.shape[0]
    act_dim = w3.shape[0]

    if compute_dtype is not None:
        x = x.astype(compute_dtype)
        w1 = w1.astype(compute_dtype)
        w2 = w2.astype(compute_dtype)
        w3 = w3.astype(compute_dtype)

    # Biases as (H, 1) f32 columns -> broadcast along the lane (batch) axis.
    b1c = b1.reshape(hidden, 1).astype(jnp.float32)
    b2c = b2.reshape(hidden, 1).astype(jnp.float32)
    b3c = b3.reshape(act_dim, 1).astype(jnp.float32)

    # Lane-dense transposed layout: batch along lanes, padded to a 128-multiple.
    tb = min(tile_b, _round_up(batch, 128))      # tile_b must be a multiple of 128
    padded_batch = _round_up(batch, tb)
    xt = jnp.pad(x.T, ((0, 0), (0, padded_batch - batch)))   # (in_dim, padded_batch)

    grid = (padded_batch // tb,)
    resident = lambda a: pl.BlockSpec(a.shape, lambda i: (0,) * a.ndim)

    out_t = pl.pallas_call(
        _policy_kernel,
        out_shape=jax.ShapeDtypeStruct((act_dim, padded_batch), jnp.float32),
        grid_spec=pltpu.PrefetchScalarGridSpec(
            num_scalar_prefetch=0,
            grid=grid,
            in_specs=[
                pl.BlockSpec((in_dim, tb), lambda i: (0, i)),   # streamed input tile
                resident(w1), resident(b1c),                    # weights: DMA'd once,
                resident(w2), resident(b2c),                    # stay resident in VMEM
                resident(w3), resident(b3c),
            ],
            out_specs=pl.BlockSpec((act_dim, tb), lambda i: (0, i)),
        ),
        compiler_params=pltpu.CompilerParams(
            dimension_semantics=("parallel",),                  # megacore-friendly
        ),
    )(xt, w1, b1c, w2, b2c, w3, b3c)

    # Back to (batch, action_dim); slice off the zero-padded batch columns.
    return out_t[:, :batch].T


def init_params(key, obs_dim, hidden, act_dim):
    """Deterministic synthetic init (Kaiming-uniform-ish, like nn.Linear).

    Weights are stored in PyTorch layout: (out_features, in_features).
    """
    keys = jax.random.split(key, 6)

    def lin(kw, kb, fan_in, fan_out):
        bound = 1.0 / jnp.sqrt(fan_in)
        w = jax.random.uniform(kw, (fan_out, fan_in), jnp.float32, -bound, bound)
        b = jax.random.uniform(kb, (fan_out,), jnp.float32, -bound, bound)
        return w, b

    w1, b1 = lin(keys[0], keys[1], obs_dim, hidden)
    w2, b2 = lin(keys[2], keys[3], hidden, hidden)
    w3, b3 = lin(keys[4], keys[5], hidden, act_dim)
    return (w1, b1, w2, b2, w3, b3)


def _reference(x, params):
    w1, b1, w2, b2, w3, b3 = params
    h1 = jnp.maximum(x @ w1.T + b1, 0.0)
    h2 = jnp.maximum(h1 @ w2.T + b2, 0.0)
    return jnp.tanh(h2 @ w3.T + b3)


if __name__ == "__main__":
    # Small shapes consistent with the module:
    #   observation_dim=16, hidden_size=32, action_dim=8, batch=8
    obs_dim, hidden, act_dim, batch = 16, 32, 8, 8

    key = jax.random.PRNGKey(0)
    k_x, k_p = jax.random.split(key)
    x = jax.random.normal(k_x, (batch, obs_dim), dtype=jnp.float32)
    params = init_params(k_p, obs_dim, hidden, act_dim)

    ref = _reference(x, params)

    # f32 path (strict check).
    out = jax.block_until_ready(policy_forward(x, params))
    assert out.shape == (batch, act_dim)
    assert jnp.allclose(out, ref, atol=1e-5, rtol=1e-5)

    # bf16 streamed-input/weight path (bandwidth optimization for v6e/v7x) —
    # loose tolerance because tanh output is O(1).
    out_bf16 = jax.block_until_ready(
        policy_forward(x, params, compute_dtype=jnp.bfloat16))
    assert out_bf16.shape == (batch, act_dim)
    assert jnp.allclose(out_bf16, ref, atol=1e-1, rtol=1e-1)

    # TODO(synk): evolve_noise_state / get_actions OU-noise + clipping are
    # host-side numpy policy-sampling utilities, not part of forward(); left out.

    print("KERNEL_OK")
</pallas_src>

<mosaic_0001>
module attributes {stable_mosaic.version = 11 : i64} {
  func.func @_policy_kernel(%arg0: i32, %arg1: memref<16x128xf32, #tpu.memory_space<vmem>>, %arg2: memref<32x16xf32, #tpu.memory_space<vmem>>, %arg3: memref<32x1xf32, #tpu.memory_space<vmem>>, %arg4: memref<32x32xf32, #tpu.memory_space<vmem>>, %arg5: memref<32x1xf32, #tpu.memory_space<vmem>>, %arg6: memref<8x32xf32, #tpu.memory_space<vmem>>, %arg7: memref<8x1xf32, #tpu.memory_space<vmem>>, %arg8: memref<8x128xf32, #tpu.memory_space<vmem>>) attributes {dimension_semantics = [#tpu.dimension_semantics<parallel>], iteration_bounds = array<i64: 1>, scalar_prefetch = 0 : i64, scratch_operands = 0 : i64, tpu.core_type = #tpu.core_type<tc>, window_params = [{transform_indices = @transform_0, window_bounds = array<i64: 16, 128>}, {pipeline_mode = #tpu.pipeline_mode<synchronous>, transform_indices = @transform_1, window_bounds = array<i64: 32, 16>}, {pipeline_mode = #tpu.pipeline_mode<synchronous>, transform_indices = @transform_2, window_bounds = array<i64: 32, 1>}, {pipeline_mode = #tpu.pipeline_mode<synchronous>, transform_indices = @transform_3, window_bounds = array<i64: 32, 32>}, {pipeline_mode = #tpu.pipeline_mode<synchronous>, transform_indices = @transform_4, window_bounds = array<i64: 32, 1>}, {pipeline_mode = #tpu.pipeline_mode<synchronous>, transform_indices = @transform_5, window_bounds = array<i64: 8, 32>}, {pipeline_mode = #tpu.pipeline_mode<synchronous>, transform_indices = @transform_6, window_bounds = array<i64: 8, 1>}, {transform_indices = @transform_7, window_bounds = array<i64: 8, 128>}]} {
    %c0 = arith.constant 0 : index
    %c0_0 = arith.constant 0 : index
    %0 = vector.load %arg1[%c0, %c0_0] : memref<16x128xf32, #tpu.memory_space<vmem>>, vector<16x128xf32>
    %c0_1 = arith.constant 0 : index
    %c0_2 = arith.constant 0 : index
    %1 = vector.load %arg2[%c0_1, %c0_2] : memref<32x16xf32, #tpu.memory_space<vmem>>, vector<32x16xf32>
    %cst = arith.constant dense<0.000000e+00> : vector<32x128xf32>
    %2 = tpu.matmul %1, %0, %cst {dimension_numbers = #tpu.dot_dimension_numbers<[1], [0], [0], [1], [0, 0, 1, 1], [], []>} : vector<32x16xf32>, vector<16x128xf32>, vector<32x128xf32> -> vector<32x128xf32>
    %c0_3 = arith.constant 0 : index
    %c0_4 = arith.constant 0 : index
    %3 = vector.load %arg3[%c0_3, %c0_4] : memref<32x1xf32, #tpu.memory_space<vmem>>, vector<32x1xf32>
    %4 = vector.broadcast %3 : vector<32x1xf32> to vector<32x128xf32>
    %5 = arith.addf %2, %4 : vector<32x128xf32>
    %cst_5 = arith.constant 0.000000e+00 : f32
    %6 = vector.broadcast %cst_5 : f32 to vector<32x128xf32>
    %7 = arith.maximumf %5, %6 : vector<32x128xf32>
    %c0_6 = arith.constant 0 : index
    %c0_7 = arith.constant 0 : index
    %8 = vector.load %arg4[%c0_6, %c0_7] : memref<32x32xf32, #tpu.memory_space<vmem>>, vector<32x32xf32>
    %cst_8 = arith.constant dense<0.000000e+00> : vector<32x128xf32>
    %9 = tpu.matmul %8, %7, %cst_8 {dimension_numbers = #tpu.dot_dimension_numbers<[1], [0], [0], [1], [0, 0, 1, 1], [], []>} : vector<32x32xf32>, vector<32x128xf32>, vector<32x128xf32> -> vector<32x128xf32>
    %c0_9 = arith.constant 0 : index
    %c0_10 = arith.constant 0 : index
    %10 = vector.load %arg5[%c0_9, %c0_10] : memref<32x1xf32, #tpu.memory_space<vmem>>, vector<32x1xf32>
    %11 = vector.broadcast %10 : vector<32x1xf32> to vector<32x128xf32>
    %12 = arith.addf %9, %11 : vector<32x128xf32>
    %cst_11 = arith.constant 0.000000e+00 : f32
    %13 = vector.broadcast %cst_11 : f32 to vector<32x128xf32>
    %14 = arith.maximumf %12, %13 : vector<32x128xf32>
    %c0_12 = arith.constant 0 : index
    %c0_13 = arith.constant 0 : index
    %15 = vector.load %arg6[%c0_12, %c0_13] : memref<8x32xf32, #tpu.memory_space<vmem>>, vector<8x32xf32>
    %cst_14 = arith.constant dense<0.000000e+00> : vector<8x128xf32>
    %16 = tpu.matmul %15, %14, %cst_14 {dimension_numbers = #tpu.dot_dimension_numbers<[1], [0], [0], [1], [0, 0, 1, 1], [], []>} : vector<8x32xf32>, vector<32x128xf32>, vector<8x128xf32> -> vector<8x128xf32>
    %c0_15 = arith.constant 0 : index
    %c0_16 = arith.constant 0 : index
    %17 = vector.load %arg7[%c0_15, %c0_16] : memref<8x1xf32, #tpu.memory_space<vmem>>, vector<8x1xf32>
    %18 = vector.broadcast %17 : vector<8x1xf32> to vector<8x128xf32>
    %19 = arith.addf %16, %18 : vector<8x128xf32>
    %20 = math.tanh %19 : vector<8x128xf32>
    %c0_17 = arith.constant 0 : index
    %c0_18 = arith.constant 0 : index
    %21 = vector.load %arg8[%c0_17, %c0_18] : memref<8x128xf32, #tpu.memory_space<vmem>>, vector<8x128xf32>
    tpu.vector_store %arg8[%c0_17, %c0_18], %20 {strides = array<i32>} : memref<8x128xf32, #tpu.memory_space<vmem>>, vector<8x128xf32>,
    return
  }
  func.func @transform_0(%arg0: i32) -> (i32, i32) {
    %c0_i32 = arith.constant 0 : i32
    %c0_i32_0 = arith.constant 0 : i32
    return %c0_i32, %arg0 : i32, i32
  }
  func.func @transform_1(%arg0: i32) -> (i32, i32) {
    %c0_i32 = arith.constant 0 : i32
    %c0_i32_0 = arith.constant 0 : i32
    %c0_i32_1 = arith.constant 0 : i32
    return %c0_i32, %c0_i32_0 : i32, i32
  }
  func.func @transform_2(%arg0: i32) -> (i32, i32) {
    %c0_i32 = arith.constant 0 : i32
    %c0_i32_0 = arith.constant 0 : i32
    %c0_i32_1 = arith.constant 0 : i32
    return %c0_i32, %c0_i32_0 : i32, i32
  }
  func.func @transform_3(%arg0: i32) -> (i32, i32) {
    %c0_i32 = arith.constant 0 : i32
    %c0_i32_0 = arith.constant 0 : i32
    %c0_i32_1 = arith.constant 0 : i32
    return %c0_i32, %c0_i32_0 : i32, i32
  }
  func.func @transform_4(%arg0: i32) -> (i32, i32) {
    %c0_i32 = arith.constant 0 : i32
    %c0_i32_0 = arith.constant 0 : i32
    %c0_i32_1 = arith.constant 0 : i32
    return %c0_i32, %c0_i32_0 : i32, i32
  }
  func.func @transform_5(%arg0: i32) -> (i32, i32) {
    %c0_i32 = arith.constant 0 : i32
    %c0_i32_0 = arith.constant 0 : i32
    %c0_i32_1 = arith.constant 0 : i32
    return %c0_i32, %c0_i32_0 : i32, i32
  }
  func.func @transform_6(%arg0: i32) -> (i32, i32) {
    %c0_i32 = arith.constant 0 : i32
    %c0_i32_0 = arith.constant 0 : i32
    %c0_i32_1 = arith.constant 0 : i32
    return %c0_i32, %c0_i32_0 : i32, i32
  }
  func.func @transform_7(%arg0: i32) -> (i32, i32) {
    %c0_i32 = arith.constant 0 : i32
    %c0_i32_0 = arith.constant 0 : i32
    return %c0_i32, %arg0 : i32, i32
  }
}

</mosaic_0001>

<bundles_post_ra>
// kernel: tpu_custom_call.1
= control target key start
LH: loop header
LB: loop body
LE: loop exit
PB: predicated region body
PF: predicated region fallthrough
CT: control target
= control target key end

     0   :  { %vm57_vm0 = vcmask 130048   ;;  %v499_v4 = vmov 0   ;;  %s625_s0 = inlined_call_operand.vmem [shape: f32[16,128], index: 0, kind: input, shape index: {}]   ;;  %s626_s1 = inlined_call_operand.vmem [shape: f32[32,16], index: 1, kind: input, shape index: {}]   ;;  %s627_s2 = inlined_call_operand.vmem [shape: f32[32,1], index: 2, kind: input, shape index: {}]   ;;  %s628_s3 = inlined_call_operand.vmem [shape: f32[32,32], index: 3, kind: input, shape index: {}]   ;;  %s629_s4 = inlined_call_operand.vmem [shape: f32[32,1], index: 4, kind: input, shape index: {}]   ;;  %s630_s5 = inlined_call_operand.vmem [shape: f32[8,32], index: 5, kind: input, shape index: {}]   ;;  %s631_s6 = inlined_call_operand.vmem [shape: f32[8,1], index: 6, kind: input, shape index: {}]   ;;  %s632_s7 = inlined_call_operand.hbm [shape: f32[8,128], index: 7, kind: output, shape index: {}]  }
   0x1   :  { %v27_v0 = vld [vmem:[%s625_s0] sm:$0xff]  ;;  %v28_v1 = vld [vmem:[%s625_s0 + $0x8] sm:$0xff]  ;;  %471 = vset.pattern.permute.xlu0 %v499_v4  ;;  %472 = vset.pattern.permute.xlu1 %v499_v4  ;;  %v35_v6 = vld [vmem:[%s627_s2 + $0x10] sm:$0xff] }
   0x2   :  { %v29_v2 = vld [vmem:[%s626_s1] sm:$0xff]  ;;  %v448_v3 = vpack.c.bf16 %v28_v1, %v27_v0  ;;  %v30_v7 = vld [vmem:[%s626_s1 + $0x8] sm:$0xff]  ;;  %49 = vperm.xlu1 %472, %v35_v6   ;;  %v31_v9 = vld [vmem:[%s626_s1 + $0x10] sm:$0xff] }
   0x3   :  { %417 = vmatprep.mubr.msk.f32.mxu0 %vm57_vm0, %v29_v2  ;;  %v33_v5 = vld [vmem:[%s627_s2] sm:$0xff]  ;;  %v34_v8 = vld [vmem:[%s627_s2 + $0x8] sm:$0xff]  ;;  %v36_v10 = vld [vmem:[%s627_s2 + $0x18] sm:$0xff] }
   0x4   :  { %449 = vmatprep.subr.bf16.mxu0 %v448_v3  ;;  %39 = vperm.xlu0 %471, %v33_v5  }
   0x5   :  { %451 = vmatpush3.bf16.msra.mxu0 %v448_v3 }
   0x6   :  { %12 = vsyncpa [#allocation3], 0  ;;  %v32_v11 = vld [vmem:[%s626_s1 + $0x18] sm:$0xff]  ;;  %v163_v12 = vld [vmem:[%s629_s4] sm:$0xff]  ;;  %54 = vperm.xlu1 %472, %v36_v10   ;;  %vm187_vm1 = vcmask 261120   ;;  %v500_v39 = vmov 0.0|0.0  }
   0x7   :  { %v164_v13 = vld [vmem:[%s629_s4 + $0x8] sm:$0xff]  ;;  %v165_v14 = vld [vmem:[%s629_s4 + $0x10] sm:$0xff]  ;;  %v166_v15 = vld [vmem:[%s629_s4 + $0x18] sm:$0xff]  ;;  %460 = vmatprep.subr.bf16.mxu0 %v500_v39  ;;  %vm501_vm2 = vmmov 0   ;;  %v502_v40 = vmov 0.0   ;;  %s503_s11 = smov [#allocation2]  }
   0x8   :  { %418 = vmatmul.mubr.msk.f32.vlgmr.msra.gmra.mrb[0].mxu0 %vm57_vm0, %v30_v7  ;;  %44 = vperm.xlu0 %471, %v34_v8   ;;  %v290_v16 = vld [vmem:[%s631_s6] sm:$0xff]  ;;  %v160_v36 = vld [vmem:[%s628_s3 + $0x8] sm:$0xff]  ;;  %v161_v37 = vld [vmem:[%s628_s3 + $0x10] sm:$0xff]  ;;  %s377_s12 = sshll.u32 %s503_s11, 4  ;;  %s378_s12 = int_to_ptr.vmem [resolvable:$true] %s377_s12 }
   0x9   :  { %420 = vmatprep.mubr.msk.f32.mxu0 %vm57_vm0, %v31_v9  ;;  %v159_v17 = vld [vmem:[%s628_s3] sm:$0xff]  ;;  %v162_v38 = vld [vmem:[%s628_s3 + $0x18] sm:$0xff]  ;;  %s475_s13 = scalar_lea.vmem %s378_s12, 128  ;;  %p480_p1 = scmp.lt.s32.totalorder %s378_s12, %s378_s12 }
   0xa   :  { %174 = vperm.xlu1 %472, %v164_v13   ;;  %431 = vmatprep.mubr.msk.f32.mxu1 %vm187_vm1, %v159_v17  ;;  %v289_v59 = vld [vmem:[%s630_s5] sm:$0xff]  ;;  %p476_p0 = scmp.ne.s32.totalorder %s378_s12, %s475_s13  ;;  %p481_p2 = scmp.lt.s32.totalorder %s475_s13, %s475_s13 }
   0xc   :  { %421 = vmatmul.mubr.msk.f32.gmra.mrb[2].mxu0 %vm57_vm0, %v32_v11  ;;  %169 = vperm.xlu0 %471, %v163_v12   ;;  %p482_p3 = por %p481_p2, %p480_p1 }
   0xd   :  { %445 = vmatprep.mubr.msk.f32.mxu0 %vm501_vm2, %v502_v40 }
   0xe   :  { %184 = vperm.xlu1 %472, %v166_v15   ;;  %p483_p4 = pnand %p482_p3, %p476_p0 }
  0x10   :  { %179 = vperm.xlu0 %471, %v165_v14  }
  0x14   :  { %293 = vperm.xlu0 %471, %v290_v16  }
  0x81   :  { %v50_v19 = vpop.permute.xlu1 %49 }
  0x83   :  { %v40_v18 = vpop.permute.xlu0 %39 }
  0x85   :  { %v55_v26 = vpop.permute.xlu1 %54 }
  0x87   :  { %v45_v20 = vpop.permute.xlu0 %44 }
  0x89   :  { %v175_v41 = vpop.permute.xlu1 %174 }
  0x8b   :  { %v170_v42 = vpop.permute.xlu0 %169 }
  0x8d   :  { %v185_v48 = vpop.permute.xlu1 %184 }
  0x8f   :  { %v180_v51 = vpop.permute.xlu0 %179 }
  0x93   :  { %v294_v60 = vpop.permute.xlu0 %293 }
  0xdb   :  { %v419_v21 = vpop.f32.mrb[0].mxu0 }
  0xdc   :  { %v142_v22 = vadd.f32 %v419_v21, %v45_v20  ;;  %v136_v23 = vpop.f32.mrb[1].mxu0 }
  0xdd   :  { %v137_v24 = vadd.f32 %v136_v23, %v40_v18 }
  0xde   :  { %v156_v25 = vmax.f32 %v142_v22, 0.0 }
  0xdf   :  { %v155_v27 = vmax.f32 %v137_v24, 0.0  ;;  %v422_v28 = vpop.f32.mrb[2].mxu0 }
  0xe0   :  { %v152_v29 = vadd.f32 %v422_v28, %v55_v26  ;;  %v146_v30 = vpop.f32.mrb[3].mxu0 }
  0xe1   :  { %v147_v31 = vadd.f32 %v146_v30, %v50_v19  ;;  %v452_v32 = vpack.c.bf16 %v156_v25, %v155_v27 }
  0xe2   :  { %v158_v33 = vmax.f32 %v152_v29, 0.0 }
  0xe3   :  { %v157_v34 = vmax.f32 %v147_v31, 0.0  ;;  %453 = vmatprep.subr.bf16.mxu1 %v452_v32 }
  0xe4   :  { %455 = vmatpush3.bf16.msra.mxu1 %v452_v32 }
  0xe5   :  { %v456_v35 = vpack.c.bf16 %v158_v33, %v157_v34 }
  0xe7   :  { %457 = vmatprep.subr.bf16.mxu1 %v456_v35 }
  0xe8   :  { %459 = vmatpush3.bf16.msra.mxu1 %v456_v35 }
  0xeb   :  { %432 = vmatmul.mubr.msk.f32.vlgmr.msra.gmra.mrb[0].mxu1 %vm187_vm1, %v160_v36 }
  0xec   :  { %434 = vmatprep.mubr.msk.f32.mxu1 %vm187_vm1, %v161_v37 }
  0xef   :  { %435 = vmatmul.mubr.msk.f32.gmra.mrb[2].mxu1 %vm187_vm1, %v162_v38 }
 0x1be   :  { %v433_v43 = vpop.f32.mrb[0].mxu1 }
 0x1bf   :  { %v272_v44 = vadd.f32 %v433_v43, %v175_v41  ;;  %v266_v45 = vpop.f32.mrb[1].mxu1 }
 0x1c0   :  { %v267_v46 = vadd.f32 %v266_v45, %v170_v42 }
 0x1c1   :  { %v286_v47 = vmax.f32 %v272_v44, 0.0 }
 0x1c2   :  { %v285_v49 = vmax.f32 %v267_v46, 0.0  ;;  %v436_v50 = vpop.f32.mrb[2].mxu1 }
 0x1c3   :  { %v282_v52 = vadd.f32 %v436_v50, %v185_v48  ;;  %v276_v53 = vpop.f32.mrb[3].mxu1 }
 0x1c4   :  { %v461_v54 = vpack.c.bf16 %v286_v47, %v285_v49  ;;  %v277_v55 = vadd.f32 %v276_v53, %v180_v51 }
 0x1c5   :  { %v288_v56 = vmax.f32 %v282_v52, 0.0 }
 0x1c6   :  { %v287_v57 = vmax.f32 %v277_v55, 0.0  ;;  %462 = vmatpush3.bf16.msra.mxu0 %v461_v54 }
 0x1c7   :  { %463 = vmatprep.subr.bf16.mxu0 %v500_v39 }
 0x1c8   :  { %v464_v58 = vpack.c.bf16 %v288_v56, %v287_v57 }
 0x1ca   :  { %465 = vmatpush3.bf16.msra.mxu0 %v464_v58 }
 0x1cd   :  { %446 = vmatmul.mubr.msk.f32.vlgmr.msra.gmra.mrb[4].mxu0 %vm187_vm1, %v289_v59 }
 0x2a0   :  { %v365_v61 = vpop.f32.mrb[4].mxu0 }
 0x2a1   :  { %v366_v62 = vadd.f32 %v365_v61, %v294_v60  ;;  %v447_v63 = vpop.f32.mrb[5].mxu0 }
 0x2a3   :  { %473 = vtanh.f32 %v366_v62 }
 0x2ad   :  { %v474_v0 = vpop.eup %473 }
 0x2ae   :  { %370 = vst [vmem:[#allocation2] sm:$0xff] %v474_v0 }
 0x2af   :  { %486 = shalt.err (!%p483_p4)
}
 0x2b0   :  { %s487_s15 = scalar_lea.hbm %s632_s7, 128 }
 0x2b1   :  { %p488_p5 = scmp.ne.s32.totalorder %s632_s7, %s487_s15  ;;  %p491_p6 = scmp.lt.u32.totalorder %s487_s15, %s632_s7 }
 0x2b3   :  { %p493_p7 = pnand %p491_p6, %p488_p5 }
 0x2b5   :  { %496 = shalt.err (!%p493_p7)
}
 0x2b6   :  { %380 = dma.vmem_to_hbm [thread:$0]  %s378_s12, 128, %s632_s7, [#allocation3]  }
 0x2b7   :  { %497 = dma.done.wait [#allocation3], 128  }
 0x2b8   :  { %498 = vsyncadd [#allocation3], 4294967168 }
 0x2b9   :  { %384 = vsyncpa [#allocation3], 1 }

</bundles_post_ra>
